<compile_context>
chip_gen: v6e
topology: v6e:2x2x1
jax: 0.10.0
libtpu: 0.0.40
codegen_flags: <defaults>
</compile_context>

<pallas_src>
import jax
import jax.numpy as jnp
from jax.experimental import pallas as pl
from jax.experimental.pallas import tpu as pltpu

STATE_DIM = 16
ACTION_DIM = 8
H1 = 256
H2 = 128


def actor_kernel(xt_ref, w1_ref, b1_ref, w2_ref, b2_ref, w3_ref, b3_ref, ot_ref):
    # Feature-major: columns are batch elements (lanes), rows are features.
    # fc1 + relu  (f32 matmul: K=16, compute is negligible, keeps x in f32)
    h1 = jnp.dot(w1_ref[...], xt_ref[...], preferred_element_type=jnp.float32)
    h1 = jnp.maximum(h1 + b1_ref[...], 0.0)                     # (H1, BT)
    # dropout1: identity at inference (eval mode)

    # fc2 + relu  (bf16 MXU operands, f32 accumulate + f32 epilogue)
    h2 = jnp.dot(w2_ref[...], h1.astype(w2_ref.dtype),
                 preferred_element_type=jnp.float32)
    h2 = jnp.maximum(h2 + b2_ref[...], 0.0)                     # (H2, BT)
    # dropout2: identity at inference (eval mode)

    # fc3 + tanh  (output rows = actions, sublane-aligned; lanes = batch)
    y = jnp.dot(w3_ref[...], h2.astype(w3_ref.dtype),
                preferred_element_type=jnp.float32)
    ot_ref[...] = jnp.tanh(y + b3_ref[...]).astype(ot_ref.dtype)  # (out_pad, BT)


def _pick_batch_tile(batch):
    """Batch tile along the lane axis: multiple of 256, capped at 1024.

    Large tiles amortize the ~0.35us per-grid-step overhead; the "half the
    (rounded) batch" rule keeps >= 2 grid steps whenever the batch spans
    >= 2 tiles, so the 'parallel' batch axis shards across both v7x cores.
    """
    b_round = ((batch + 255) // 256) * 256
    half = (b_round // 2) // 256 * 256
    return int(min(1024, max(256, half)))


def prepare_params(params):
    """One-time weight preprocessing (hoisted out of the per-call path).

    Input: PyTorch-layout params (W[out, in], b[out]) in f32.
    Output: fc1 in f32 (accuracy; K=16 so cost is nil), fc2/fc3 weights in
    bf16, biases as [out, 1] f32 columns, fc3 rows padded to a multiple of 8
    so the feature-major output tile is sublane-aligned.
    """
    w1, b1, w2, b2, w3, b3 = params
    out_dim = w3.shape[0]
    out_pad = ((out_dim + 7) // 8) * 8
    w3p = jnp.pad(w3, ((0, out_pad - out_dim), (0, 0)))
    b3p = jnp.pad(b3, ((0, out_pad - out_dim),))
    return (
        w1.astype(jnp.float32),
        b1.reshape(-1, 1).astype(jnp.float32),
        w2.astype(jnp.bfloat16),
        b2.reshape(-1, 1).astype(jnp.float32),
        w3p.astype(jnp.bfloat16),
        b3p.reshape(-1, 1).astype(jnp.float32),
    )


def actor_forward(state, prepped, *, action_dim=ACTION_DIM):
    """state: [B, STATE_DIM] float32 -> [B, action_dim] float32."""
    w1, b1, w2, b2, w3, b3 = prepped
    batch, state_dim = state.shape
    out_pad = w3.shape[0]

    bt = _pick_batch_tile(batch)
    grid = (pl.cdiv(batch, bt),)

    # Feature-major input: [state_dim, B]; batch rides on the 128-lane axis.
    xt = state.T

    yt = pl.pallas_call(
        actor_kernel,
        out_shape=jax.ShapeDtypeStruct((out_pad, batch), jnp.float32),
        grid_spec=pltpu.PrefetchScalarGridSpec(
            num_scalar_prefetch=0,
            grid=grid,
            in_specs=[
                pl.BlockSpec((state_dim, bt), lambda i: (0, i)),   # x^T tile
                pl.BlockSpec((H1, state_dim), lambda i: (0, 0)),   # w1 (f32)
                pl.BlockSpec((H1, 1), lambda i: (0, 0)),           # b1
                pl.BlockSpec((H2, H1), lambda i: (0, 0)),          # w2 (bf16)
                pl.BlockSpec((H2, 1), lambda i: (0, 0)),           # b2
                pl.BlockSpec((out_pad, H2), lambda i: (0, 0)),     # w3 (bf16)
                pl.BlockSpec((out_pad, 1), lambda i: (0, 0)),      # b3
            ],
            out_specs=pl.BlockSpec((out_pad, bt), lambda i: (0, i)),
        ),
        compiler_params=pltpu.CompilerParams(
            dimension_semantics=("parallel",),
        ),
    )(xt, w1, b1, w2, b2, w3, b3)

    # Only action_dim x B real data comes back; transpose/slice is a tiny copy.
    return yt[:action_dim, :].T


def init_params(key, state_dim, action_dim):
    """Deterministic synthetic parameters (PyTorch Linear-style uniform init,
    stored in PyTorch layout: W[out, in], b[out])."""
    ks = jax.random.split(key, 6)

    def linear(kw, kb, fan_in, fan_out):
        bound = 1.0 / jnp.sqrt(fan_in)
        w = jax.random.uniform(kw, (fan_out, fan_in), jnp.float32, -bound, bound)
        b = jax.random.uniform(kb, (fan_out,), jnp.float32, -bound, bound)
        return w, b

    w1, b1 = linear(ks[0], ks[1], state_dim, H1)
    w2, b2 = linear(ks[2], ks[3], H1, H2)
    w3, b3 = linear(ks[4], ks[5], H2, action_dim)
    return (w1, b1, w2, b2, w3, b3)


def actor_ref(state, params):
    """Pure-JAX f32 reference (PyTorch-layout weights) for correctness check."""
    w1, b1, w2, b2, w3, b3 = params
    x = jnp.maximum(state @ w1.T + b1, 0.0)
    x = jnp.maximum(x @ w2.T + b2, 0.0)
    return jnp.tanh(x @ w3.T + b3)


if __name__ == "__main__":
    key = jax.random.PRNGKey(0)
    k_params, k_state1, k_state2 = jax.random.split(key, 3)

    params = init_params(k_params, STATE_DIM, ACTION_DIM)
    prepped = prepare_params(params)   # one-time; NOT in the per-call path

    fwd = jax.jit(actor_forward, static_argnames=("action_dim",))

    # Small batch (single ragged tile).
    B = 8
    state = jax.random.normal(k_state1, (B, STATE_DIM), jnp.float32)
    out = jax.block_until_ready(fwd(state, prepped, action_dim=ACTION_DIM))
    ref = actor_ref(state, params)
    assert out.shape == (B, ACTION_DIM)
    # fc2/fc3 run with bf16 MXU operands (f32 accumulate, tanh-bounded output).
    assert jnp.allclose(out, ref, atol=3e-2, rtol=0.0), (
        float(jnp.max(jnp.abs(out - ref))))

    # Medium batch: exercises multi-step grid + ragged last tile.
    B2 = 300
    state2 = jax.random.normal(k_state2, (B2, STATE_DIM), jnp.float32)
    out2 = jax.block_until_ready(fwd(state2, prepped, action_dim=ACTION_DIM))
    ref2 = actor_ref(state2, params)
    assert out2.shape == (B2, ACTION_DIM)
    assert jnp.allclose(out2, ref2, atol=3e-2, rtol=0.0), (
        float(jnp.max(jnp.abs(out2 - ref2))))

    print("KERNEL_OK")
</pallas_src>

<mosaic_0001>
module attributes {stable_mosaic.version = 11 : i64} {
  func.func @actor_kernel(%arg0: i32, %arg1: memref<16x256xf32, #tpu.memory_space<vmem>>, %arg2: memref<256x16xf32, #tpu.memory_space<vmem>>, %arg3: memref<256x1xf32, #tpu.memory_space<vmem>>, %arg4: memref<128x256xbf16, #tpu.memory_space<vmem>>, %arg5: memref<128x1xf32, #tpu.memory_space<vmem>>, %arg6: memref<8x128xbf16, #tpu.memory_space<vmem>>, %arg7: memref<8x1xf32, #tpu.memory_space<vmem>>, %arg8: memref<8x256xf32, #tpu.memory_space<vmem>>) attributes {dimension_semantics = [#tpu.dimension_semantics<parallel>], iteration_bounds = array<i64: 1>, scalar_prefetch = 0 : i64, scratch_operands = 0 : i64, tpu.core_type = #tpu.core_type<tc>, window_params = [{transform_indices = @transform_0, window_bounds = array<i64: 16, 256>}, {pipeline_mode = #tpu.pipeline_mode<synchronous>, transform_indices = @transform_1, window_bounds = array<i64: 256, 16>}, {pipeline_mode = #tpu.pipeline_mode<synchronous>, transform_indices = @transform_2, window_bounds = array<i64: 256, 1>}, {pipeline_mode = #tpu.pipeline_mode<synchronous>, transform_indices = @transform_3, window_bounds = array<i64: 128, 256>}, {pipeline_mode = #tpu.pipeline_mode<synchronous>, transform_indices = @transform_4, window_bounds = array<i64: 128, 1>}, {pipeline_mode = #tpu.pipeline_mode<synchronous>, transform_indices = @transform_5, window_bounds = array<i64: 8, 128>}, {pipeline_mode = #tpu.pipeline_mode<synchronous>, transform_indices = @transform_6, window_bounds = array<i64: 8, 1>}, {transform_indices = @transform_7, window_bounds = array<i64: 8, 256>}]} {
    %c0 = arith.constant 0 : index
    %c0_0 = arith.constant 0 : index
    %0 = vector.load %arg2[%c0, %c0_0] : memref<256x16xf32, #tpu.memory_space<vmem>>, vector<256x16xf32>
    %c0_1 = arith.constant 0 : index
    %c0_2 = arith.constant 0 : index
    %1 = vector.load %arg1[%c0_1, %c0_2] : memref<16x256xf32, #tpu.memory_space<vmem>>, vector<16x256xf32>
    %cst = arith.constant dense<0.000000e+00> : vector<256x256xf32>
    %2 = tpu.matmul %0, %1, %cst {dimension_numbers = #tpu.dot_dimension_numbers<[1], [0], [0], [1], [0, 0, 1, 1], [], []>} : vector<256x16xf32>, vector<16x256xf32>, vector<256x256xf32> -> vector<256x256xf32>
    %c0_3 = arith.constant 0 : index
    %c0_4 = arith.constant 0 : index
    %3 = vector.load %arg3[%c0_3, %c0_4] : memref<256x1xf32, #tpu.memory_space<vmem>>, vector<256x1xf32>
    %4 = vector.broadcast %3 : vector<256x1xf32> to vector<256x256xf32>
    %5 = arith.addf %2, %4 : vector<256x256xf32>
    %cst_5 = arith.constant 0.000000e+00 : f32
    %6 = vector.broadcast %cst_5 : f32 to vector<256x256xf32>
    %7 = arith.maximumf %5, %6 : vector<256x256xf32>
    %c0_6 = arith.constant 0 : index
    %c0_7 = arith.constant 0 : index
    %8 = vector.load %arg4[%c0_6, %c0_7] : memref<128x256xbf16, #tpu.memory_space<vmem>>, vector<128x256xbf16>
    %9 = arith.truncf %7 : vector<256x256xf32> to vector<256x256xbf16>
    %cst_8 = arith.constant dense<0.000000e+00> : vector<128x256xf32>
    %10 = tpu.matmul %8, %9, %cst_8 {dimension_numbers = #tpu.dot_dimension_numbers<[1], [0], [0], [1], [0, 0, 1, 1], [], []>} : vector<128x256xbf16>, vector<256x256xbf16>, vector<128x256xf32> -> vector<128x256xf32>
    %c0_9 = arith.constant 0 : index
    %c0_10 = arith.constant 0 : index
    %11 = vector.load %arg5[%c0_9, %c0_10] : memref<128x1xf32, #tpu.memory_space<vmem>>, vector<128x1xf32>
    %12 = vector.broadcast %11 : vector<128x1xf32> to vector<128x256xf32>
    %13 = arith.addf %10, %12 : vector<128x256xf32>
    %cst_11 = arith.constant 0.000000e+00 : f32
    %14 = vector.broadcast %cst_11 : f32 to vector<128x256xf32>
    %15 = arith.maximumf %13, %14 : vector<128x256xf32>
    %c0_12 = arith.constant 0 : index
    %c0_13 = arith.constant 0 : index
    %16 = vector.load %arg6[%c0_12, %c0_13] : memref<8x128xbf16, #tpu.memory_space<vmem>>, vector<8x128xbf16>
    %17 = arith.truncf %15 : vector<128x256xf32> to vector<128x256xbf16>
    %cst_14 = arith.constant dense<0.000000e+00> : vector<8x256xf32>
    %18 = tpu.matmul %16, %17, %cst_14 {dimension_numbers = #tpu.dot_dimension_numbers<[1], [0], [0], [1], [0, 0, 1, 1], [], []>} : vector<8x128xbf16>, vector<128x256xbf16>, vector<8x256xf32> -> vector<8x256xf32>
    %c0_15 = arith.constant 0 : index
    %c0_16 = arith.constant 0 : index
    %19 = vector.load %arg7[%c0_15, %c0_16] : memref<8x1xf32, #tpu.memory_space<vmem>>, vector<8x1xf32>
    %20 = vector.broadcast %19 : vector<8x1xf32> to vector<8x256xf32>
    %21 = arith.addf %18, %20 : vector<8x256xf32>
    %22 = math.tanh %21 : vector<8x256xf32>
    %c0_17 = arith.constant 0 : index
    %c0_18 = arith.constant 0 : index
    %23 = vector.load %arg8[%c0_17, %c0_18] : memref<8x256xf32, #tpu.memory_space<vmem>>, vector<8x256xf32>
    tpu.vector_store %arg8[%c0_17, %c0_18], %22 {strides = array<i32>} : memref<8x256xf32, #tpu.memory_space<vmem>>, vector<8x256xf32>,
    return
  }
  func.func @transform_0(%arg0: i32) -> (i32, i32) {
    %c0_i32 = arith.constant 0 : i32
    %c0_i32_0 = arith.constant 0 : i32
    return %c0_i32, %arg0 : i32, i32
  }
  func.func @transform_1(%arg0: i32) -> (i32, i32) {
    %c0_i32 = arith.constant 0 : i32
    %c0_i32_0 = arith.constant 0 : i32
    %c0_i32_1 = arith.constant 0 : i32
    return %c0_i32, %c0_i32_0 : i32, i32
  }
  func.func @transform_2(%arg0: i32) -> (i32, i32) {
    %c0_i32 = arith.constant 0 : i32
    %c0_i32_0 = arith.constant 0 : i32
    %c0_i32_1 = arith.constant 0 : i32
    return %c0_i32, %c0_i32_0 : i32, i32
  }
  func.func @transform_3(%arg0: i32) -> (i32, i32) {
    %c0_i32 = arith.constant 0 : i32
    %c0_i32_0 = arith.constant 0 : i32
    %c0_i32_1 = arith.constant 0 : i32
    return %c0_i32, %c0_i32_0 : i32, i32
  }
  func.func @transform_4(%arg0: i32) -> (i32, i32) {
    %c0_i32 = arith.constant 0 : i32
    %c0_i32_0 = arith.constant 0 : i32
    %c0_i32_1 = arith.constant 0 : i32
    return %c0_i32, %c0_i32_0 : i32, i32
  }
  func.func @transform_5(%arg0: i32) -> (i32, i32) {
    %c0_i32 = arith.constant 0 : i32
    %c0_i32_0 = arith.constant 0 : i32
    %c0_i32_1 = arith.constant 0 : i32
    return %c0_i32, %c0_i32_0 : i32, i32
  }
  func.func @transform_6(%arg0: i32) -> (i32, i32) {
    %c0_i32 = arith.constant 0 : i32
    %c0_i32_0 = arith.constant 0 : i32
    %c0_i32_1 = arith.constant 0 : i32
    return %c0_i32, %c0_i32_0 : i32, i32
  }
  func.func @transform_7(%arg0: i32) -> (i32, i32) {
    %c0_i32 = arith.constant 0 : i32
    %c0_i32_0 = arith.constant 0 : i32
    return %c0_i32, %arg0 : i32, i32
  }
}

</mosaic_0001>

<bundles_post_ra>
// kernel: actor_forward.1
= control target key start
LH: loop header
LB: loop body
LE: loop exit
PB: predicated region body
PF: predicated region fallthrough
CT: control target
= control target key end

     0   :  { %v101_v0 = vld [vmem:[#allocation2 + $0x10] sm:$0xff]  ;;  %v99_v2 = vld [vmem:[#allocation2 + $0x18] sm:$0xff]  ;;  %v1272_v4 = vmov 0.0   ;;  %vm294_vm0 = vcmask 130048   ;;  %v1943_v6 = vmov 0   ;;  %s1935_s0 = inlined_call_operand.vmem [shape: f32[16,8], index: 0, kind: input, shape index: {}]   ;;  %s1936_s1 = inlined_call_operand.vmem [shape: f32[256,16], index: 1, kind: input, shape index: {}]   ;;  %s1937_s2 = inlined_call_operand.vmem [shape: f32[256,1], index: 2, kind: input, shape index: {}]   ;;  %s1938_s3 = inlined_call_operand.vmem [shape: bf16[128,256], index: 3, kind: input, shape index: {}]   ;;  %s1939_s4 = inlined_call_operand.vmem [shape: f32[128,1], index: 4, kind: input, shape index: {}]   ;;  %s1940_s5 = inlined_call_operand.vmem [shape: bf16[8,128], index: 5, kind: input, shape index: {}]   ;;  %s1941_s6 = inlined_call_operand.vmem [shape: f32[8,1], index: 6, kind: input, shape index: {}]   ;;  %s1942_s7 = inlined_call_operand.vmem [shape: f32[8,8], index: 7, kind: output, shape index: {}]  }
   0x1   :  { %v46_v1 = vld [vmem:[%s1935_s0 + $0x8] sm:$0xff]  ;;  %419 = vmatprep.subr.mxu0 %v101_v0  ;;  %v44_v3 = vld [vmem:[%s1935_s0] sm:$0xff]  ;;  %455 = vmatprep.mubr.f32.mxu0 %v1272_v4  ;;  %v116_v7 = vld [vmem:[%s1937_s2 + $0x70] sm:$0xff] }
   0x2   :  { %420 = vmatpush1.msra.mxu0 %v46_v1  ;;  %v66_v5 = vld [vmem:[%s1936_s1] sm:$0xff]  ;;  %1244 = vset.pattern.permute.xlu0 %v1943_v6  ;;  %v67_v8 = vld [vmem:[%s1936_s1 + $0x8] sm:$0xff]  ;;  %v117_v10 = vld [vmem:[%s1937_s2 + $0x78] sm:$0xff] }
   0x3   :  { %421 = vmatprep.subr.mxu0 %v99_v2  ;;  %1245 = vset.pattern.permute.xlu1 %v1943_v6  ;;  %v114_v9 = vld [vmem:[%s1937_s2 + $0x60] sm:$0xff]  ;;  %v115_v11 = vld [vmem:[%s1937_s2 + $0x68] sm:$0xff]  ;;  %v68_v12 = vld [vmem:[%s1936_s1 + $0x10] sm:$0xff] }
   0x4   :  { %422 = vmatpush1.msra.mxu0 %v44_v3  ;;  %206 = vperm.xlu0 %1244, %v116_v7   ;;  %v112_v13 = vld [vmem:[%s1937_s2 + $0x50] sm:$0xff]  ;;  %v113_v14 = vld [vmem:[%s1937_s2 + $0x58] sm:$0xff]  ;;  %v110_v16 = vld [vmem:[%s1937_s2 + $0x40] sm:$0xff] }
   0x5   :  { %1194 = vmatmul.mubr.msk.f32.vlgmr.msra.gmra.mxu0 %vm294_vm0, %v66_v5  ;;  %196 = vperm.xlu1 %1245, %v114_v9   ;;  %v69_v15 = vld [vmem:[%s1936_s1 + $0x18] sm:$0xff]  ;;  %v111_v17 = vld [vmem:[%s1937_s2 + $0x48] sm:$0xff]  ;;  %v70_v18 = vld [vmem:[%s1936_s1 + $0x20] sm:$0xff] }
   0x6   :  { %461 = vmatprep.mubr.f32.mxu0 %v1272_v4  ;;  %v108_v19 = vld [vmem:[%s1937_s2 + $0x30] sm:$0xff]  ;;  %v109_v20 = vld [vmem:[%s1937_s2 + $0x38] sm:$0xff]  ;;  %v71_v21 = vld [vmem:[%s1936_s1 + $0x28] sm:$0xff] }
   0x7   :  { %v106_v22 = vld [vmem:[%s1937_s2 + $0x20] sm:$0xff]  ;;  %v107_v23 = vld [vmem:[%s1937_s2 + $0x28] sm:$0xff]  ;;  %v72_v24 = vld [vmem:[%s1936_s1 + $0x30] sm:$0xff] }
   0x8   :  { %211 = vperm.xlu0 %1244, %v117_v10   ;;  %v104_v25 = vld [vmem:[%s1937_s2 + $0x10] sm:$0xff]  ;;  %v73_v26 = vld [vmem:[%s1936_s1 + $0x38] sm:$0xff]  ;;  %v102_v28 = vld [vmem:[%s1937_s2] sm:$0xff] }
   0x9   :  { %1195 = vmatmul.mubr.msk.f32.gmra.mxu0 %vm294_vm0, %v67_v8  ;;  %201 = vperm.xlu1 %1245, %v115_v11   ;;  %v105_v27 = vld [vmem:[%s1937_s2 + $0x18] sm:$0xff]  ;;  %v103_v29 = vld [vmem:[%s1937_s2 + $0x8] sm:$0xff]  ;;  %v74_v30 = vld [vmem:[%s1936_s1 + $0x40] sm:$0xff] }
   0xa   :  { %467 = vmatprep.mubr.f32.mxu0 %v1272_v4  ;;  %v132_v31 = vld [vmem:[%s1937_s2 + $0xf0] sm:$0xff]  ;;  %v133_v32 = vld [vmem:[%s1937_s2 + $0xf8] sm:$0xff]  ;;  %v75_v33 = vld [vmem:[%s1936_s1 + $0x48] sm:$0xff] }
   0xb   :  { %v130_v34 = vld [vmem:[%s1937_s2 + $0xe0] sm:$0xff]  ;;  %v131_v35 = vld [vmem:[%s1937_s2 + $0xe8] sm:$0xff]  ;;  %v76_v36 = vld [vmem:[%s1936_s1 + $0x50] sm:$0xff] }
   0xc   :  { %186 = vperm.xlu0 %1244, %v112_v13   ;;  %v128_v37 = vld [vmem:[%s1937_s2 + $0xd0] sm:$0xff]  ;;  %v129_v38 = vld [vmem:[%s1937_s2 + $0xd8] sm:$0xff]  ;;  %v126_v40 = vld [vmem:[%s1937_s2 + $0xc0] sm:$0xff] }
   0xd   :  { %1196 = vmatmul.mubr.msk.f32.gmra.mxu0 %vm294_vm0, %v68_v12  ;;  %191 = vperm.xlu1 %1245, %v113_v14   ;;  %v77_v39 = vld [vmem:[%s1936_s1 + $0x58] sm:$0xff]  ;;  %v127_v41 = vld [vmem:[%s1937_s2 + $0xc8] sm:$0xff]  ;;  %v78_v42 = vld [vmem:[%s1936_s1 + $0x60] sm:$0xff] }
   0xe   :  { %473 = vmatprep.mubr.f32.mxu0 %v1272_v4  ;;  %v124_v43 = vld [vmem:[%s1937_s2 + $0xb0] sm:$0xff]  ;;  %v125_v44 = vld [vmem:[%s1937_s2 + $0xb8] sm:$0xff]  ;;  %v79_v45 = vld [vmem:[%s1936_s1 + $0x68] sm:$0xff] }
   0xf   :  { %v122_v46 = vld [vmem:[%s1937_s2 + $0xa0] sm:$0xff]  ;;  %v123_v47 = vld [vmem:[%s1937_s2 + $0xa8] sm:$0xff]  ;;  %v80_v48 = vld [vmem:[%s1936_s1 + $0x70] sm:$0xff] }
  0x10   :  { %176 = vperm.xlu0 %1244, %v110_v16   ;;  %v120_v49 = vld [vmem:[%s1937_s2 + $0x90] sm:$0xff]  ;;  %v121_v50 = vld [vmem:[%s1937_s2 + $0x98] sm:$0xff]  ;;  %v118_v52 = vld [vmem:[%s1937_s2 + $0x80] sm:$0xff] }
  0x11   :  { %1197 = vmatmul.mubr.msk.f32.gmra.mxu0 %vm294_vm0, %v69_v15  ;;  %181 = vperm.xlu1 %1245, %v111_v17   ;;  %v81_v51 = vld [vmem:[%s1936_s1 + $0x78] sm:$0xff]  ;;  %v119_v53 = vld [vmem:[%s1937_s2 + $0x88] sm:$0xff]  ;;  %v82_v54 = vld [vmem:[%s1936_s1 + $0x80] sm:$0xff] }
  0x12   :  { %479 = vmatprep.mubr.f32.mxu0 %v1272_v4  ;;  %v774_v55 = vld [vmem:[%s1939_s4 + $0x70] sm:$0xff]  ;;  %v775_v56 = vld [vmem:[%s1939_s4 + $0x78] sm:$0xff]  ;;  %v83_v57 = vld [vmem:[%s1936_s1 + $0x88] sm:$0xff] }
  0x13   :  { %v772_v58 = vld [vmem:[%s1939_s4 + $0x60] sm:$0xff]  ;;  %v773_v59 = vld [vmem:[%s1939_s4 + $0x68] sm:$0xff]  ;;  %v84_v60 = vld [vmem:[%s1936_s1 + $0x90] sm:$0xff] }
  0x14   :  { %166 = vperm.xlu0 %1244, %v108_v19   ;;  %v770_v61 = vld [vmem:[%s1939_s4 + $0x50] sm:$0xff]  ;;  %v771_v62 = vld [vmem:[%s1939_s4 + $0x58] sm:$0xff]  ;;  %v768_v0 = vld [vmem:[%s1939_s4 + $0x40] sm:$0xff] }
  0x15   :  { %1198 = vmatmul.mubr.msk.f32.gmra.mxu0 %vm294_vm0, %v70_v18  ;;  %171 = vperm.xlu1 %1245, %v109_v20   ;;  %v85_v63 = vld [vmem:[%s1936_s1 + $0x98] sm:$0xff]  ;;  %v769_v1 = vld [vmem:[%s1939_s4 + $0x48] sm:$0xff]  ;;  %v86_v2 = vld [vmem:[%s1936_s1 + $0xa0] sm:$0xff] }
  0x16   :  { %485 = vmatprep.mubr.f32.mxu0 %v1272_v4  ;;  %v766_v3 = vld [vmem:[%s1939_s4 + $0x30] sm:$0xff]  ;;  %v767_v5 = vld [vmem:[%s1939_s4 + $0x38] sm:$0xff]  ;;  %v87_v7 = vld [vmem:[%s1936_s1 + $0xa8] sm:$0xff] }
  0x17   :  { %v764_v8 = vld [vmem:[%s1939_s4 + $0x20] sm:$0xff]  ;;  %v765_v9 = vld [vmem:[%s1939_s4 + $0x28] sm:$0xff]  ;;  %v88_v10 = vld [vmem:[%s1936_s1 + $0xb0] sm:$0xff] }
  0x18   :  { %156 = vperm.xlu0 %1244, %v106_v22   ;;  %v762_v11 = vld [vmem:[%s1939_s4 + $0x10] sm:$0xff]  ;;  %v763_v12 = vld [vmem:[%s1939_s4 + $0x18] sm:$0xff]  ;;  %v760_v14 = vld [vmem:[%s1939_s4] sm:$0xff] }
  0x19   :  { %1199 = vmatmul.mubr.msk.f32.gmra.mxu0 %vm294_vm0, %v71_v21  ;;  %161 = vperm.xlu1 %1245, %v107_v23   ;;  %v89_v13 = vld [vmem:[%s1936_s1 + $0xb8] sm:$0xff]  ;;  %v761_v15 = vld [vmem:[%s1939_s4 + $0x8] sm:$0xff]  ;;  %v90_v16 = vld [vmem:[%s1936_s1 + $0xc0] sm:$0xff] }
  0x1a   :  { %491 = vmatprep.mubr.f32.mxu0 %v1272_v4  ;;  %v1098_v17 = vld [vmem:[%s1941_s6] sm:$0xff]  ;;  %v91_v18 = vld [vmem:[%s1936_s1 + $0xc8] sm:$0xff]  ;;  %v92_v19 = vld [vmem:[%s1936_s1 + $0xd0] sm:$0xff] }
  0x1b   :  { %v93_v20 = vld [vmem:[%s1936_s1 + $0xd8] sm:$0xff]  ;;  %v94_v21 = vld [vmem:[%s1936_s1 + $0xe0] sm:$0xff]  ;;  %v95_v22 = vld [vmem:[%s1936_s1 + $0xe8] sm:$0xff] }
  0x1c   :  { %146 = vperm.xlu0 %1244, %v104_v25   ;;  %v96_v23 = vld [vmem:[%s1936_s1 + $0xf0] sm:$0xff] }
  0x1d   :  { %1200 = vmatmul.mubr.msk.f32.gmra.mxu0 %vm294_vm0, %v72_v24  ;;  %151 = vperm.xlu1 %1245, %v105_v27   ;;  %v97_v24 = vld [vmem:[%s1936_s1 + $0xf8] sm:$0xff] }
  0x1e   :  { %497 = vmatprep.mubr.f32.mxu0 %v1272_v4 }
  0x20   :  { %136 = vperm.xlu0 %1244, %v102_v28  }
  0x21   :  { %1201 = vmatmul.mubr.msk.f32.gmra.mxu0 %vm294_vm0, %v73_v26  ;;  %141 = vperm.xlu1 %1245, %v103_v29  }
  0x22   :  { %503 = vmatprep.mubr.f32.mxu0 %v1272_v4 }
  0x24   :  { %286 = vperm.xlu0 %1244, %v132_v31  }
  0x25   :  { %1202 = vmatmul.mubr.msk.f32.gmra.mxu0 %vm294_vm0, %v74_v30  ;;  %291 = vperm.xlu1 %1245, %v133_v32  }
  0x26   :  { %509 = vmatprep.mubr.f32.mxu0 %v1272_v4 }
  0x28   :  { %276 = vperm.xlu0 %1244, %v130_v34  }
  0x29   :  { %1203 = vmatmul.mubr.msk.f32.gmra.mxu0 %vm294_vm0, %v75_v33  ;;  %281 = vperm.xlu1 %1245, %v131_v35  }
  0x2a   :  { %515 = vmatprep.mubr.f32.mxu0 %v1272_v4 }
  0x2c   :  { %266 = vperm.xlu0 %1244, %v128_v37  }
  0x2d   :  { %1204 = vmatmul.mubr.msk.f32.gmra.mxu0 %vm294_vm0, %v76_v36  ;;  %271 = vperm.xlu1 %1245, %v129_v38  }
  0x2e   :  { %521 = vmatprep.mubr.f32.mxu0 %v1272_v4 }
  0x30   :  { %256 = vperm.xlu0 %1244, %v126_v40  }
  0x31   :  { %1205 = vmatmul.mubr.msk.f32.gmra.mxu0 %vm294_vm0, %v77_v39  ;;  %261 = vperm.xlu1 %1245, %v127_v41  }
  0x32   :  { %527 = vmatprep.mubr.f32.mxu0 %v1272_v4 }
  0x34   :  { %246 = vperm.xlu0 %1244, %v124_v43  }
  0x35   :  { %1206 = vmatmul.mubr.msk.f32.gmra.mxu0 %vm294_vm0, %v78_v42  ;;  %251 = vperm.xlu1 %1245, %v125_v44  }
  0x36   :  { %533 = vmatprep.mubr.f32.mxu0 %v1272_v4 }
  0x38   :  { %236 = vperm.xlu0 %1244, %v122_v46  }
  0x39   :  { %1207 = vmatmul.mubr.msk.f32.gmra.mxu0 %vm294_vm0, %v79_v45  ;;  %241 = vperm.xlu1 %1245, %v123_v47  }
  0x3a   :  { %539 = vmatprep.mubr.f32.mxu0 %v1272_v4 }
  0x3c   :  { %226 = vperm.xlu0 %1244, %v120_v49  }
  0x3d   :  { %1208 = vmatmul.mubr.msk.f32.gmra.mxu0 %vm294_vm0, %v80_v48  ;;  %231 = vperm.xlu1 %1245, %v121_v50  }
  0x3e   :  { %545 = vmatprep.mubr.f32.mxu0 %v1272_v4 }
  0x40   :  { %216 = vperm.xlu0 %1244, %v118_v52  }
  0x41   :  { %1209 = vmatmul.mubr.msk.f32.gmra.mxu0 %vm294_vm0, %v81_v51  ;;  %221 = vperm.xlu1 %1245, %v119_v53  }
  0x42   :  { %551 = vmatprep.mubr.f32.mxu0 %v1272_v4 }
  0x44   :  { %848 = vperm.xlu0 %1244, %v774_v55  }
  0x45   :  { %1210 = vmatmul.mubr.msk.f32.gmra.mxu0 %vm294_vm0, %v82_v54  ;;  %853 = vperm.xlu1 %1245, %v775_v56  }
  0x46   :  { %557 = vmatprep.mubr.f32.mxu0 %v1272_v4 }
  0x48   :  { %838 = vperm.xlu0 %1244, %v772_v58  }
  0x49   :  { %1211 = vmatmul.mubr.msk.f32.gmra.mxu0 %vm294_vm0, %v83_v57  ;;  %843 = vperm.xlu1 %1245, %v773_v59  }
  0x4a   :  { %563 = vmatprep.mubr.f32.mxu0 %v1272_v4 }
  0x4c   :  { %828 = vperm.xlu0 %1244, %v770_v61  }
  0x4d   :  { %1212 = vmatmul.mubr.msk.f32.gmra.mxu0 %vm294_vm0, %v84_v60  ;;  %833 = vperm.xlu1 %1245, %v771_v62  }
  0x4e   :  { %569 = vmatprep.mubr.f32.mxu0 %v1272_v4 }
  0x50   :  { %818 = vperm.xlu0 %1244, %v768_v0  }
  0x51   :  { %1213 = vmatmul.mubr.msk.f32.gmra.mxu0 %vm294_vm0, %v85_v63  ;;  %823 = vperm.xlu1 %1245, %v769_v1  }
  0x52   :  { %575 = vmatprep.mubr.f32.mxu0 %v1272_v4 }
  0x54   :  { %808 = vperm.xlu0 %1244, %v766_v3  }
  0x55   :  { %1214 = vmatmul.mubr.msk.f32.gmra.mxu0 %vm294_vm0, %v86_v2  ;;  %813 = vperm.xlu1 %1245, %v767_v5  }
  0x56   :  { %581 = vmatprep.mubr.f32.mxu0 %v1272_v4 }
  0x58   :  { %798 = vperm.xlu0 %1244, %v764_v8  }
  0x59   :  { %1215 = vmatmul.mubr.msk.f32.gmra.mxu0 %vm294_vm0, %v87_v7  ;;  %803 = vperm.xlu1 %1245, %v765_v9  }
  0x5a   :  { %587 = vmatprep.mubr.f32.mxu0 %v1272_v4 }
  0x5c   :  { %788 = vperm.xlu0 %1244, %v762_v11  }
  0x5d   :  { %1216 = vmatmul.mubr.msk.f32.gmra.mxu0 %vm294_vm0, %v88_v10  ;;  %793 = vperm.xlu1 %1245, %v763_v12  }
  0x5e   :  { %593 = vmatprep.mubr.f32.mxu0 %v1272_v4 }
  0x60   :  { %778 = vperm.xlu0 %1244, %v760_v14  }
  0x61   :  { %1217 = vmatmul.mubr.msk.f32.gmra.mxu0 %vm294_vm0, %v89_v13  ;;  %783 = vperm.xlu1 %1245, %v761_v15  }
  0x62   :  { %599 = vmatprep.mubr.f32.mxu0 %v1272_v4 }
  0x64   :  { %1101 = vperm.xlu0 %1244, %v1098_v17  }
  0x65   :  { %1218 = vmatmul.mubr.msk.f32.gmra.mxu0 %vm294_vm0, %v90_v16 }
  0x66   :  { %605 = vmatprep.mubr.f32.mxu0 %v1272_v4 }
  0x69   :  { %1219 = vmatmul.mubr.msk.f32.gmra.mxu0 %vm294_vm0, %v91_v18 }
  0x6a   :  { %611 = vmatprep.mubr.f32.mxu0 %v1272_v4 }
  0x6d   :  { %1220 = vmatmul.mubr.msk.f32.gmra.mxu0 %vm294_vm0, %v92_v19 }
  0x6e   :  { %617 = vmatprep.mubr.f32.mxu0 %v1272_v4 }
  0x71   :  { %1221 = vmatmul.mubr.msk.f32.gmra.mxu0 %vm294_vm0, %v93_v20  ;;  %v1248_v20 = vld [vmem:[%s1938_s3 + $0x4] ss:$8 sps:$4 sm:$0xff]  }
  0x72   :  { %623 = vmatprep.mubr.f32.mxu0 %v1272_v4  ;;  %968 = vmatprep.mubr.bf16.mxu1 %v1248_v20 }
  0x75   :  { %1222 = vmatmul.mubr.msk.f32.gmra.mxu0 %vm294_vm0, %v94_v21 }
  0x76   :  { %629 = vmatprep.mubr.f32.mxu0 %v1272_v4 }
  0x79   :  { %1223 = vmatmul.mubr.msk.f32.gmra.mxu0 %vm294_vm0, %v95_v22 }
  0x7a   :  { %635 = vmatprep.mubr.f32.mxu0 %v1272_v4 }
  0x7d   :  { %1224 = vmatmul.mubr.msk.f32.gmra.mxu0 %vm294_vm0, %v96_v23 }
  0x7e   :  { %641 = vmatprep.mubr.f32.mxu0 %v1272_v4 }
  0x7f   :  { %v1629_v25 = vpop.permute.xlu0 %206 }
  0x80   :  { %v1631_v26 = vpop.permute.xlu1 %196 }
  0x81   :  { %1225 = vmatmul.mubr.msk.f32.gmra.mxu0 %vm294_vm0, %v97_v24 }
  0x83   :  { %v1633_v27 = vpop.permute.xlu0 %211 }
  0x84   :  { %v1635_v28 = vpop.permute.xlu1 %201 }
  0x87   :  { %v1637_v29 = vpop.permute.xlu0 %186 }
  0x88   :  { %v1639_v30 = vpop.permute.xlu1 %191 }
  0x8b   :  { %v1641_v31 = vpop.permute.xlu0 %176 }
  0x8c   :  { %v1643_v4 = vpop.permute.xlu1 %181 }
  0x8f   :  { %v1645_v32 = vpop.permute.xlu0 %166 }
  0x90   :  { %v1647_v33 = vpop.permute.xlu1 %171 }
  0x93   :  { %v1649_v34 = vpop.permute.xlu0 %156 }
  0x94   :  { %v1651_v35 = vpop.permute.xlu1 %161 }
  0x97   :  { %v147_v36 = vpop.permute.xlu0 %146 }
  0x98   :  { %v152_v37 = vpop.permute.xlu1 %151 }
  0x9b   :  { %v137_v38 = vpop.permute.xlu0 %136 }
  0x9c   :  { %v142_v41 = vpop.permute.xlu1 %141 }
  0x9f   :  { %v1671_v11 = vpop.permute.xlu0 %286 }
  0xa0   :  { %v1675_v13 = vpop.permute.xlu1 %291 }
  0xa3   :  { %v1679_v15 = vpop.permute.xlu0 %276 }
  0xa4   :  { %v1683_v18 = vpop.permute.xlu1 %281 }
  0xa7   :  { %v1688_v21 = vpop.permute.xlu0 %266 }
  0xa8   :  { %v1692_v24 = vpop.permute.xlu1 %271 }
  0xc5   :  { %v457_v39 = vpop.f32.mrf.mxu0 }
  0xc6   :  { %v458_v42 = vadd.f32 %v457_v39, %v137_v38 }
  0xc7   :  { %v459_v40 = vpop.f32.mrf.mxu0 }
  0xc8   :  { %v460_v44 = vadd.f32 %v459_v40, %v137_v38  ;;  %v648_v47 = vmax.f32 %v458_v42, 0.0  ;;  %v1696_v40 = vpop.permute.xlu1 %261 }
  0xc9   :  { %v463_v43 = vpop.f32.mrf.mxu0 }
  0xca   :  { %v464_v45 = vadd.f32 %v463_v43, %v142_v41  ;;  %v649_v51 = vmax.f32 %v460_v44, 0.0 }
  0xcb   :  { %v465_v46 = vpop.f32.mrf.mxu0 }
  0xcc   :  { %v650_v48 = vmax.f32 %v464_v45, 0.0  ;;  %v466_v49 = vadd.f32 %v465_v46, %v142_v41  ;;  %v1700_v44 = vpop.permute.xlu1 %251 }
  0xcd   :  { %v469_v50 = vpop.f32.mrf.mxu0  ;;  %1951 = vst [vmem:[#allocation6_spill] sm:$0xff] %v1700_v44 }
  0xce   :  { %v1653_v52 = vpack.c.bf16 %v650_v48, %v648_v47  ;;  %v651_v53 = vmax.f32 %v466_v49, 0.0  ;;  %v470_v56 = vadd.f32 %v469_v50, %v147_v36 }
  0xcf   :  { %v471_v54 = vpop.f32.mrf.mxu0 }
  0xd0   :  { %v1655_v55 = vpack.c.bf16 %v651_v53, %v649_v51  ;;  %v472_v58 = vadd.f32 %v471_v54, %v147_v36  ;;  %v652_v61 = vmax.f32 %v470_v56, 0.0  ;;  %v1704_v49 = vpop.permute.xlu1 %241 }
  0xd1   :  { %v475_v57 = vpop.f32.mrf.mxu0  ;;  %1953 = vst [vmem:[#allocation8_spill] sm:$0xff] %v1704_v49 }
  0xd2   :  { %v476_v59 = vadd.f32 %v475_v57, %v152_v37  ;;  %v653_v1 = vmax.f32 %v472_v58, 0.0 }
  0xd3   :  { %v477_v60 = vpop.f32.mrf.mxu0 }
  0xd4   :  { %v654_v62 = vmax.f32 %v476_v59, 0.0  ;;  %v478_v63 = vadd.f32 %v477_v60, %v152_v37  ;;  %v1694_v37 = vpop.permute.xlu0 %256  ;;  %v1712_v60 = vpop.permute.xlu1 %231 }
  0xd5   :  { %v1657_v0 = vpop.f32.mrf.mxu0  ;;  %1949 = vst [vmem:[#allocation4_spill] sm:$0xff] %v1694_v37 }
  0xd6   :  { %v1659_v2 = vpack.c.bf16 %v654_v62, %v652_v61  ;;  %v655_v3 = vmax.f32 %v478_v63, 0.0 }
  0xd7   :  { %v1661_v5 = vpop.f32.mrf.mxu0 }
  0xd8   :  { %v1663_v7 = vpack.c.bf16 %v655_v3, %v653_v1  ;;  %v1698_v42 = vpop.permute.xlu0 %246 }
  0xd9   :  { %v1665_v8 = vpop.f32.mrf.mxu0  ;;  %1950 = vst [vmem:[#allocation5_spill] sm:$0xff] %v1698_v42 }
  0xdb   :  { %v1667_v9 = vpop.f32.mrf.mxu0 }
  0xdc   :  { %v1702_v47 = vpop.permute.xlu0 %236 }
  0xdd   :  { %v1669_v10 = vpop.f32.mrf.mxu0  ;;  %1952 = vst [vmem:[#allocation7_spill] sm:$0xff] %v1702_v47 }
  0xdf   :  { %v1673_v12 = vpop.f32.mrf.mxu0 }
  0xe0   :  { %v1706_v53 = vpop.permute.xlu0 %226 }
  0xe1   :  { %v1677_v14 = vpop.f32.mrf.mxu0 }
  0xe3   :  { %v501_v16 = vpop.f32.mrf.mxu0 }
  0xe4   :  { %v217_v49 = vpop.permute.xlu0 %216 }
  0xe5   :  { %v1681_v17 = vpop.f32.mrf.mxu0 }
  0xe7   :  { %v507_v19 = vpop.f32.mrf.mxu0 }
  0xe9   :  { %v1690_v22 = vpop.f32.mrf.mxu0 }
  0xeb   :  { %v513_v23 = vpop.f32.mrf.mxu0 }
  0xed   :  { %v517_v36 = vpop.f32.mrf.mxu0 }
  0xef   :  { %v519_v38 = vpop.f32.mrf.mxu0 }
  0xf0   :  { %v520_v42 = vadd.f32 %v519_v38, %v1637_v29  ;;  %v508_v38 = vadd.f32 %v507_v19, %v1641_v31 }
  0xf1   :  { %v523_v39 = vpop.f32.mrf.mxu0 }
  0xf3   :  { %v525_v41 = vpop.f32.mrf.mxu0 }
  0xf4   :  { %v526_v6 = vadd.f32 %v525_v41, %v1639_v30 }
  0xf5   :  { %v529_v43 = vpop.f32.mrf.mxu0 }
  0xf7   :  { %v531_v45 = vpop.f32.mrf.mxu0 }
  0xf8   :  { %v532_v62 = vadd.f32 %v531_v45, %v1631_v26 }
  0xf9   :  { %v535_v46 = vpop.f32.mrf.mxu0 }
  0xfa   :  { %v536_v1 = vadd.f32 %v535_v46, %v1635_v28  ;;  %v673_v44 = vmax.f32 %v532_v62, 0.0 }
  0xfb   :  { %v537_v48 = vpop.f32.mrf.mxu0 }
  0xfc   :  { %v538_v56 = vadd.f32 %v537_v48, %v1635_v28  ;;  %v524_v28 = vadd.f32 %v523_v39, %v1639_v30  ;;  %v674_v46 = vmax.f32 %v536_v1, 0.0 }
  0xfd   :  { %v541_v50 = vpop.f32.mrf.mxu0 }
  0xfe   :  { %v542_v59 = vadd.f32 %v541_v50, %v1629_v25  ;;  %v675_v48 = vmax.f32 %v538_v56, 0.0 }
  0xff   :  { %v543_v51 = vpop.f32.mrf.mxu0 }
 0x100   :  { %v544_v57 = vadd.f32 %v543_v51, %v1629_v25  ;;  %v676_v25 = vmax.f32 %v542_v59, 0.0  ;;  %v518_v59 = vadd.f32 %v517_v36, %v1637_v29  ;;  %v506_v36 = vadd.f32 %v1681_v17, %v1641_v31 }
 0x101   :  { %v547_v54 = vpop.f32.mrf.mxu0 }
 0x102   :  { %v548_v58 = vadd.f32 %v547_v54, %v1633_v27  ;;  %v677_v47 = vmax.f32 %v544_v57, 0.0  ;;  %v530_v54 = vadd.f32 %v529_v43, %v1631_v26  ;;  %v671_v57 = vmax.f32 %v526_v6, 0.0 }
 0x103   :  { %v549_v61 = vpop.f32.mrf.mxu0  ;;  %v502_v43 = vadd.f32 %v501_v16, %v1647_v33  ;;  %v512_v6 = vadd.f32 %v1690_v22, %v1643_v4 }
 0x104   :  { %v550_v63 = vadd.f32 %v549_v61, %v1633_v27  ;;  %v678_v3 = vmax.f32 %v548_v58, 0.0  ;;  %v514_v27 = vadd.f32 %v513_v23, %v1643_v4  ;;  %v222_v58 = vpop.permute.xlu1 %221  ;;  %v741_v61 = vpack.c.bf16 %v675_v48, %v673_v44 }
 0x105   :  { %v553_v20 = vpop.f32.mrf.mxu0  ;;  %v669_v23 = vmax.f32 %v520_v42, 0.0  ;;  %v668_v42 = vmax.f32 %v518_v59, 0.0 }
 0x106   :  { %v679_v51 = vmax.f32 %v550_v63, 0.0  ;;  %v554_v45 = vadd.f32 %v553_v20, %v217_v49  ;;  %v742_v56 = vpack.c.bf16 %v678_v3, %v676_v25  ;;  %v667_v44 = vmax.f32 %v514_v27, 0.0 }
 0x107   :  { %v555_v50 = vpop.f32.mrf.mxu0  ;;  %v739_v16 = vpack.c.bf16 %v671_v57, %v669_v23  ;;  %v490_v25 = vadd.f32 %v1667_v9, %v1651_v35  ;;  %v663_v27 = vmax.f32 %v502_v43, 0.0 }
 0x108   :  { %v743_v37 = vpack.c.bf16 %v679_v51, %v677_v47  ;;  %v556_v63 = vadd.f32 %v555_v50, %v217_v49  ;;  %v672_v47 = vmax.f32 %v530_v54, 0.0  ;;  %v680_v30 = vmax.f32 %v554_v45, 0.0 }
 0x109   :  { %v559_v41 = vpop.f32.mrf.mxu0  ;;  %v670_v49 = vmax.f32 %v524_v28, 0.0  ;;  %v496_v51 = vadd.f32 %v1673_v12, %v1645_v32  ;;  %v665_v54 = vmax.f32 %v508_v38, 0.0  ;;  %v500_v50 = vadd.f32 %v1677_v14, %v1647_v33 }
 0x10a   :  { %v560_v26 = vadd.f32 %v559_v41, %v222_v58  ;;  %936 = vmatprep.subr.bf16.mxu1 %v743_v37  ;;  %v740_v37 = vpack.c.bf16 %v674_v46, %v672_v47  ;;  %v681_v20 = vmax.f32 %v556_v63, 0.0  ;;  %v666_v45 = vmax.f32 %v512_v6, 0.0 }
 0x10b   :  { %v561_v62 = vpop.f32.mrf.mxu0  ;;  %937 = vmatpush1.bf16.msra.mxu1 %v742_v56  ;;  %v738_v31 = vpack.c.bf16 %v670_v49, %v668_v42  ;;  %v737_v28 = vpack.c.bf16 %v667_v44, %v665_v54  ;;  %v494_v41 = vadd.f32 %v1669_v10, %v1645_v32  ;;  %v664_v56 = vmax.f32 %v506_v36, 0.0 }
 0x10c   :  { %v682_v39 = vmax.f32 %v560_v26, 0.0  ;;  %v562_v1 = vadd.f32 %v561_v62, %v222_v58  ;;  %938 = vmatprep.subr.bf16.mxu1 %v741_v61  ;;  %v484_v58 = vadd.f32 %v1661_v5, %v1649_v34  ;;  %v661_v57 = vmax.f32 %v496_v51, 0.0 }
 0x10d   :  { %v565_v3 = vpop.f32.mrf.mxu0  ;;  %v659_v63 = vmax.f32 %v490_v25, 0.0  ;;  %v662_v26 = vmax.f32 %v500_v50, 0.0  ;;  %v736_v43 = vpack.c.bf16 %v666_v45, %v664_v56  ;;  %v482_v47 = vadd.f32 %v1657_v0, %v1649_v34 }
 0x10e   :  { %v1727_v19 = vpack.c.bf16 %v682_v39, %v680_v30  ;;  %v683_v29 = vmax.f32 %v562_v1, 0.0  ;;  %v566_v22 = vadd.f32 %v565_v3, %v1706_v53  ;;  %v735_v5 = vpack.c.bf16 %v663_v27, %v661_v57 }
 0x10f   :  { %v567_v48 = vpop.f32.mrf.mxu0  ;;  %939 = vmatpush1.bf16.msra.mxu1 %v740_v37  ;;  %v660_v62 = vmax.f32 %v494_v41, 0.0  ;;  %v656_v6 = vmax.f32 %v482_v47, 0.0 }
 0x110   :  { %v1733_v4 = vpack.c.bf16 %v683_v29, %v681_v20  ;;  %940 = vmatprep.subr.bf16.mxu1 %v739_v16  ;;  %v568_v46 = vadd.f32 %v567_v48, %v1706_v53  ;;  %v684_v33 = vmax.f32 %v566_v22, 0.0  ;;  %v488_v53 = vadd.f32 %v1665_v8, %v1651_v35 }
 0x111   :  { %v571_v17 = vpop.f32.mrf.mxu0  ;;  %v734_v8 = vpack.c.bf16 %v662_v26, %v660_v62  ;;  %v1954_v62 = vld [vmem:[#allocation4_spill] sm:$0xff] }
 0x112   :  { %v572_v12 = vadd.f32 %v571_v17, %v1712_v60  ;;  %v685_v59 = vmax.f32 %v568_v46, 0.0  ;;  %v658_v35 = vmax.f32 %v488_v53, 0.0 }
 0x113   :  { %v573_v9 = vpop.f32.mrf.mxu0  ;;  %941 = vmatpush1.bf16.msra.mxu1 %v738_v31 }
 0x114   :  { %v686_v14 = vmax.f32 %v572_v12, 0.0  ;;  %v574_v61 = vadd.f32 %v573_v9, %v1712_v60  ;;  %942 = vmatprep.subr.bf16.mxu1 %v737_v28  ;;  %v657_v60 = vmax.f32 %v484_v58, 0.0  ;;  %v732_v49 = vpack.c.bf16 %v658_v35, %v656_v6 }
 0x115   :  { %v1749_v38 = vpop.f32.mrf.mxu0 }
 0x116   :  { %v1751_v32 = vpack.c.bf16 %v686_v14, %v684_v33  ;;  %v687_v10 = vmax.f32 %v574_v61, 0.0  ;;  %v733_v1 = vpack.c.bf16 %v659_v63, %v657_v60 }
 0x117   :  { %v1755_v23 = vpop.f32.mrf.mxu0  ;;  %943 = vmatpush1.bf16.msra.mxu1 %v736_v43 }
 0x118   :  { %v1757_v30 = vpack.c.bf16 %v687_v10, %v685_v59  ;;  %944 = vmatprep.subr.bf16.mxu1 %v735_v5 }
 0x119   :  { %v1759_v39 = vpop.f32.mrf.mxu0 }
 0x11b   :  { %v1761_v44 = vpop.f32.mrf.mxu0  ;;  %945 = vmatpush1.bf16.msra.mxu1 %v734_v8 }
 0x11c   :  { %946 = vmatprep.subr.bf16.mxu1 %v733_v1 }
 0x11d   :  { %v1763_v34 = vpop.f32.mrf.mxu0 }
 0x11f   :  { %v1765_v0 = vpop.f32.mrf.mxu0  ;;  %947 = vmatpush1.bf16.msra.mxu1 %v732_v49 }
 0x120   :  { %948 = vmatprep.subr.bf16.mxu1 %v1663_v7 }
 0x121   :  { %v1768_v37 = vpop.f32.mrf.mxu0 }
 0x123   :  { %v597_v3 = vpop.f32.mrf.mxu0  ;;  %949 = vmatpush1.bf16.msra.mxu1 %v1659_v2 }
 0x124   :  { %950 = vmatprep.subr.bf16.mxu1 %v1655_v55 }
 0x125   :  { %v601_v16 = vpop.f32.mrf.mxu0 }
 0x127   :  { %v603_v20 = vpop.f32.mrf.mxu0  ;;  %951 = vmatpush1.bf16.msra.mxu1 %v1653_v52 }
 0x129   :  { %v607_v29 = vpop.f32.mrf.mxu0 }
 0x12a   :  { %v608_v35 = vadd.f32 %v607_v29, %v1696_v40  ;;  %v1957_v29 = vld [vmem:[#allocation8_spill] sm:$0xff] }
 0x12b   :  { %v609_v36 = vpop.f32.mrf.mxu0 }
 0x12d   :  { %v613_v42 = vpop.f32.mrf.mxu0 }
 0x12e   :  { %v614_v10 = vadd.f32 %v613_v42, %v1688_v21 }
 0x12f   :  { %v615_v48 = vpop.f32.mrf.mxu0 }
 0x130   :  { %v616_v53 = vadd.f32 %v615_v48, %v1688_v21 }
 0x131   :  { %v619_v51 = vpop.f32.mrf.mxu0 }
 0x132   :  { %v620_v26 = vadd.f32 %v619_v51, %v1692_v24  ;;  %v701_v60 = vmax.f32 %v616_v53, 0.0  ;;  %v700_v51 = vmax.f32 %v614_v10, 0.0  ;;  %v1267_v53 = vld [vmem:[%s1938_s3 + $0x74] ss:$8 sps:$4 sm:$0xff]  }
 0x133   :  { %v621_v54 = vpop.f32.mrf.mxu0 }
 0x134   :  { %v622_v56 = vadd.f32 %v621_v54, %v1692_v24  ;;  %v702_v8 = vmax.f32 %v620_v26, 0.0  ;;  %v1955_v24 = vld [vmem:[#allocation6_spill] sm:$0xff]  ;;  %v1956_v54 = vld [vmem:[#allocation5_spill] sm:$0xff]  ;;  %v1854_v26 = vpop.permute.xlu0 %848 }
 0x135   :  { %v625_v22 = vpop.f32.mrf.mxu0  ;;  %v598_v6 = vadd.f32 %v597_v3, %v1955_v24  ;;  %v592_v21 = vadd.f32 %v1765_v0, %v1956_v54 }
 0x136   :  { %v626_v14 = vadd.f32 %v625_v22, %v1679_v15  ;;  %v698_v22 = vmax.f32 %v608_v35, 0.0 }
 0x137   :  { %v627_v25 = vpop.f32.mrf.mxu0  ;;  %v695_v3 = vmax.f32 %v598_v6, 0.0 }
 0x138   :  { %v628_v46 = vadd.f32 %v627_v25, %v1679_v15  ;;  %v704_v47 = vmax.f32 %v626_v14, 0.0  ;;  %v604_v15 = vadd.f32 %v603_v20, %v1954_v62  ;;  %v596_v20 = vadd.f32 %v1768_v37, %v1955_v24  ;;  %v1264_v14 = vld [vmem:[%s1938_s3 + $0x64] ss:$8 sps:$4 sm:$0xff]  }
 0x139   :  { %v631_v7 = vpop.f32.mrf.mxu0  ;;  %v586_v25 = vadd.f32 %v1761_v44, %v1957_v29  ;;  %v584_v37 = vadd.f32 %v1759_v39, %v1957_v29  ;;  %v1249_v39 = vld [vmem:[%s1938_s3 + $0x14] ss:$8 sps:$4 sm:$0xff]  }
 0x13a   :  { %v632_v58 = vadd.f32 %v631_v7, %v1683_v18  ;;  %v705_v63 = vmax.f32 %v628_v46, 0.0  ;;  %v697_v42 = vmax.f32 %v604_v15, 0.0 }
 0x13b   :  { %v633_v50 = vpop.f32.mrf.mxu0 }
 0x13c   :  { %v634_v2 = vadd.f32 %v633_v50, %v1683_v18  ;;  %v706_v43 = vmax.f32 %v632_v58, 0.0  ;;  %v703_v18 = vmax.f32 %v622_v56, 0.0  ;;  %v1258_v56 = vld [vmem:[%s1938_s3 + $0x44] ss:$8 sps:$4 sm:$0xff]  }
 0x13d   :  { %v637_v45 = vpop.f32.mrf.mxu0 }
 0x13e   :  { %v638_v52 = vadd.f32 %v637_v45, %v1671_v11  ;;  %v707_v9 = vmax.f32 %v634_v2, 0.0  ;;  %v756_v1 = vpack.c.bf16 %v706_v43, %v704_v47  ;;  %v755_v48 = vpack.c.bf16 %v703_v18, %v701_v60  ;;  %v1958_v45 = vld [vmem:[#allocation7_spill] sm:$0xff]  ;;  %v1856_v43 = vpop.permute.xlu1 %853 }
 0x13f   :  { %v639_v31 = vpop.f32.mrf.mxu0  ;;  %v580_v0 = vadd.f32 %v1755_v23, %v1958_v45  ;;  %v578_v44 = vadd.f32 %v1749_v38, %v1958_v45  ;;  %v1246_v38 = vld [vmem:[%s1938_s3] ss:$8 sps:$4 sm:$0xff]  }
 0x140   :  { %v640_v55 = vadd.f32 %v639_v31, %v1671_v11  ;;  %v708_v61 = vmax.f32 %v638_v52, 0.0  ;;  %v757_v59 = vpack.c.bf16 %v707_v9, %v705_v63  ;;  %v693_v31 = vmax.f32 %v592_v21, 0.0  ;;  %v1260_v9 = vld [vmem:[%s1938_s3 + $0x40] ss:$8 sps:$4 sm:$0xff]   ;;  %v1269_v63 = vld [vmem:[%s1938_s3 + $0x70] ss:$8 sps:$4 sm:$0xff]  }
 0x141   :  { %v643_v17 = vpop.f32.mrf.mxu0  ;;  %v688_v23 = vmax.f32 %v578_v44, 0.0 }
 0x142   :  { %v644_v27 = vadd.f32 %v643_v17, %v1675_v13  ;;  %v709_v57 = vmax.f32 %v640_v55, 0.0  ;;  %v694_v17 = vmax.f32 %v596_v20, 0.0  ;;  %v691_v55 = vmax.f32 %v586_v25, 0.0 }
 0x143   :  { %v645_v28 = vpop.f32.mrf.mxu0 }
 0x144   :  { %v646_v12 = vadd.f32 %v645_v28, %v1675_v13  ;;  %v710_v41 = vmax.f32 %v644_v27, 0.0  ;;  %v610_v13 = vadd.f32 %v609_v36, %v1696_v40  ;;  %v602_v36 = vadd.f32 %v601_v16, %v1954_v62 }
 0x145   :  { %v754_v40 = vpack.c.bf16 %v702_v8, %v700_v51  ;;  %v590_v16 = vadd.f32 %v1763_v34, %v1956_v54  ;;  %v751_v27 = vpack.c.bf16 %v695_v3, %v693_v31  ;;  %v689_v34 = vmax.f32 %v580_v0, 0.0 }
 0x146   :  { %v711_v33 = vmax.f32 %v646_v12, 0.0  ;;  %v758_v5 = vpack.c.bf16 %v710_v41, %v708_v61  ;;  %v699_v49 = vmax.f32 %v610_v13, 0.0  ;;  %v696_v50 = vmax.f32 %v602_v36, 0.0  ;;  %v1257_v41 = vld [vmem:[%s1938_s3 + $0x30] ss:$8 sps:$4 sm:$0xff]   ;;  %v1860_v13 = vpop.permute.xlu1 %843 }
 0x147   :  { %v692_v52 = vmax.f32 %v590_v16, 0.0  ;;  %v690_v28 = vmax.f32 %v584_v37, 0.0  ;;  %v749_v12 = vpack.c.bf16 %v691_v55, %v689_v34  ;;  %v1266_v61 = vld [vmem:[%s1938_s3 + $0x60] ss:$8 sps:$4 sm:$0xff]  }
 0x148   :  { %v759_v11 = vpack.c.bf16 %v711_v33, %v709_v57  ;;  %v753_v7 = vpack.c.bf16 %v699_v49, %v697_v42  ;;  %v752_v2 = vpack.c.bf16 %v698_v22, %v696_v50  ;;  %v1261_v57 = vld [vmem:[%s1938_s3 + $0x54] ss:$8 sps:$4 sm:$0xff]   ;;  %v1263_v33 = vld [vmem:[%s1938_s3 + $0x50] ss:$8 sps:$4 sm:$0xff]  }
 0x149   :  { %v750_v46 = vpack.c.bf16 %v694_v17, %v692_v52  ;;  %v748_v58 = vpack.c.bf16 %v690_v28, %v688_v23 }
 0x14a   :  { %952 = vmatprep.subr.bf16.mxu1 %v759_v11  ;;  %v1959_v11 = vmov 0  }
 0x14b   :  { %953 = vmatpush2.bf16.msra.mxu1 %v758_v5  ;;  %v1858_v5 = vpop.permute.xlu0 %838 }
 0x14c   :  { %954 = vmatprep.subr.bf16.mxu1 %v757_v59  ;;  %v1864_v59 = vpop.permute.xlu1 %833 }
 0x14f   :  { %955 = vmatpush2.bf16.msra.mxu1 %v756_v1  ;;  %v1862_v18 = vpop.permute.xlu0 %828 }
 0x150   :  { %956 = vmatprep.subr.bf16.mxu1 %v755_v48  ;;  %v1868_v47 = vpop.permute.xlu1 %823 }
 0x153   :  { %957 = vmatpush2.bf16.msra.mxu1 %v754_v40  ;;  %v1866_v10 = vpop.permute.xlu0 %818 }
 0x154   :  { %958 = vmatprep.subr.bf16.mxu1 %v753_v7  ;;  %v1872_v15 = vpop.permute.xlu1 %813 }
 0x157   :  { %959 = vmatpush2.bf16.msra.mxu1 %v752_v2  ;;  %v1870_v62 = vpop.permute.xlu0 %808 }
 0x158   :  { %960 = vmatprep.subr.bf16.mxu1 %v751_v27  ;;  %v1876_v35 = vpop.permute.xlu1 %803 }
 0x15b   :  { %961 = vmatpush2.bf16.msra.mxu1 %v750_v46  ;;  %v1874_v60 = vpop.permute.xlu0 %798 }
 0x15c   :  { %962 = vmatprep.subr.bf16.mxu1 %v749_v12  ;;  %v794_v1 = vpop.permute.xlu1 %793 }
 0x15f   :  { %963 = vmatpush2.bf16.msra.mxu1 %v748_v58  ;;  %v789_v8 = vpop.permute.xlu0 %788 }
 0x160   :  { %964 = vmatprep.subr.bf16.mxu1 %v1757_v30  ;;  %v1251_v30 = vld [vmem:[%s1938_s3 + $0x10] ss:$8 sps:$4 sm:$0xff]   ;;  %v784_v36 = vpop.permute.xlu1 %783 }
 0x163   :  { %965 = vmatpush2.bf16.msra.mxu1 %v1751_v32  ;;  %v1255_v32 = vld [vmem:[%s1938_s3 + $0x34] ss:$8 sps:$4 sm:$0xff]   ;;  %v779_v6 = vpop.permute.xlu0 %778 }
 0x164   :  { %966 = vmatprep.subr.bf16.mxu1 %v1733_v4  ;;  %v1252_v4 = vld [vmem:[%s1938_s3 + $0x24] ss:$8 sps:$4 sm:$0xff]  }
 0x167   :  { %967 = vmatpush2.bf16.msra.mxu1 %v1727_v19  ;;  %v1254_v19 = vld [vmem:[%s1938_s3 + $0x20] ss:$8 sps:$4 sm:$0xff]  }
 0x16a   :  { %969 = vmatmul.mubr.bf16.vlgmr.msra.gmra.mxu1 %v1246_v38 }
 0x16b   :  { %978 = vmatprep.mubr.bf16.mxu1 %v1249_v39 }
 0x172   :  { %979 = vmatmul.mubr.bf16.gmra.mxu1 %v1251_v30 }
 0x173   :  { %988 = vmatprep.mubr.bf16.mxu1 %v1252_v4 }
 0x17a   :  { %989 = vmatmul.mubr.bf16.gmra.mxu1 %v1254_v19 }
 0x17b   :  { %998 = vmatprep.mubr.bf16.mxu1 %v1255_v32 }
 0x182   :  { %999 = vmatmul.mubr.bf16.gmra.mxu1 %v1257_v41 }
 0x183   :  { %1008 = vmatprep.mubr.bf16.mxu1 %v1258_v56 }
 0x18a   :  { %1009 = vmatmul.mubr.bf16.gmra.mxu1 %v1260_v9 }
 0x18b   :  { %1018 = vmatprep.mubr.bf16.mxu1 %v1261_v57 }
 0x192   :  { %1019 = vmatmul.mubr.bf16.gmra.mxu1 %v1263_v33 }
 0x193   :  { %1028 = vmatprep.mubr.bf16.mxu1 %v1264_v14 }
 0x19a   :  { %1029 = vmatmul.mubr.bf16.gmra.mxu1 %v1266_v61 }
 0x19b   :  { %1038 = vmatprep.mubr.bf16.mxu1 %v1267_v53 }
 0x1a2   :  { %1039 = vmatmul.mubr.bf16.gmra.mxu1 %v1269_v63 }
 0x1a3   :  { %1136 = vmatprep.mubr.bf16.mxu1 %v1959_v11 }
 0x22a   :  { %v970_v24 = vpop.f32.mrf.mxu1 }
 0x22b   :  { %v971_v48 = vadd.f32 %v970_v24, %v779_v6 }
 0x22c   :  { %v972_v49 = vpop.f32.mrf.mxu1 }
 0x22d   :  { %v973_v54 = vadd.f32 %v972_v49, %v779_v6  ;;  %v1049_v20 = vmax.f32 %v971_v48, 0.0 }
 0x22e   :  { %v974_v51 = vpop.f32.mrf.mxu1 }
 0x22f   :  { %v975_v21 = vadd.f32 %v974_v51, %v784_v36  ;;  %v1050_v25 = vmax.f32 %v973_v54, 0.0 }
 0x230   :  { %v976_v42 = vpop.f32.mrf.mxu1 }
 0x231   :  { %v1051_v22 = vmax.f32 %v975_v21, 0.0  ;;  %v977_v40 = vadd.f32 %v976_v42, %v784_v36 }
 0x232   :  { %v980_v29 = vpop.f32.mrf.mxu1 }
 0x233   :  { %v1878_v3 = vpack.c.bf16 %v1051_v22, %v1049_v20  ;;  %v1052_v7 = vmax.f32 %v977_v40, 0.0  ;;  %v981_v45 = vadd.f32 %v980_v29, %v789_v8 }
 0x234   :  { %v982_v16 = vpop.f32.mrf.mxu1 }
 0x235   :  { %v1880_v50 = vpack.c.bf16 %v1052_v7, %v1050_v25  ;;  %v983_v31 = vadd.f32 %v982_v16, %v789_v8  ;;  %v1053_v2 = vmax.f32 %v981_v45, 0.0 }
 0x236   :  { %v984_v0 = vpop.f32.mrf.mxu1 }
 0x237   :  { %v985_v37 = vadd.f32 %v984_v0, %v794_v1  ;;  %v1054_v52 = vmax.f32 %v983_v31, 0.0 }
 0x238   :  { %v986_v17 = vpop.f32.mrf.mxu1 }
 0x239   :  { %v1055_v55 = vmax.f32 %v985_v37, 0.0  ;;  %v987_v27 = vadd.f32 %v986_v17, %v794_v1 }
 0x23a   :  { %v1882_v44 = vpop.f32.mrf.mxu1 }
 0x23b   :  { %v1884_v34 = vpack.c.bf16 %v1055_v55, %v1053_v2  ;;  %v1056_v28 = vmax.f32 %v987_v27, 0.0 }
 0x23c   :  { %v1886_v46 = vpop.f32.mrf.mxu1 }
 0x23d   :  { %v1888_v12 = vpack.c.bf16 %v1056_v28, %v1054_v52 }
 0x23e   :  { %v1890_v23 = vpop.f32.mrf.mxu1 }
 0x240   :  { %v1892_v58 = vpop.f32.mrf.mxu1 }
 0x242   :  { %v1894_v38 = vpop.f32.mrf.mxu1 }
 0x244   :  { %v1002_v39 = vpop.f32.mrf.mxu1 }
 0x246   :  { %v1004_v30 = vpop.f32.mrf.mxu1 }
 0x248   :  { %v1006_v4 = vpop.f32.mrf.mxu1 }
 0x24a   :  { %v1010_v19 = vpop.f32.mrf.mxu1 }
 0x24c   :  { %v1012_v32 = vpop.f32.mrf.mxu1 }
 0x24e   :  { %v1014_v41 = vpop.f32.mrf.mxu1 }
 0x24f   :  { %v1015_v28 = vadd.f32 %v1014_v41, %v1868_v47 }
 0x250   :  { %v1016_v56 = vpop.f32.mrf.mxu1 }
 0x252   :  { %v1020_v9 = vpop.f32.mrf.mxu1 }
 0x253   :  { %v1021_v55 = vadd.f32 %v1020_v9, %v1862_v18 }
 0x254   :  { %v1022_v57 = vpop.f32.mrf.mxu1 }
 0x255   :  { %v1023_v45 = vadd.f32 %v1022_v57, %v1862_v18  ;;  %v1003_v18 = vadd.f32 %v1002_v39, %v1870_v62 }
 0x256   :  { %v1024_v33 = vpop.f32.mrf.mxu1 }
 0x257   :  { %v1025_v31 = vadd.f32 %v1024_v33, %v1864_v59  ;;  %v1070_v52 = vmax.f32 %v1023_v45, 0.0  ;;  %v1062_v39 = vmax.f32 %v1003_v18, 0.0 }
 0x258   :  { %v1026_v14 = vpop.f32.mrf.mxu1 }
 0x259   :  { %v1027_v22 = vadd.f32 %v1026_v14, %v1864_v59  ;;  %v1071_v57 = vmax.f32 %v1025_v31, 0.0  ;;  %v1007_v59 = vadd.f32 %v1006_v4, %v1872_v15  ;;  %v1001_v4 = vadd.f32 %v1894_v38, %v1870_v62 }
 0x25a   :  { %v1030_v61 = vpop.f32.mrf.mxu1 }
 0x25b   :  { %v1031_v7 = vadd.f32 %v1030_v61, %v1858_v5  ;;  %v1064_v41 = vmax.f32 %v1007_v59, 0.0 }
 0x25c   :  { %v1032_v53 = vpop.f32.mrf.mxu1 }
 0x25d   :  { %v1033_v54 = vadd.f32 %v1032_v53, %v1858_v5  ;;  %v1073_v27 = vmax.f32 %v1031_v7, 0.0  ;;  %v1013_v5 = vadd.f32 %v1012_v32, %v1866_v10  ;;  %v1069_v53 = vmax.f32 %v1021_v55, 0.0 }
 0x25e   :  { %v1034_v63 = vpop.f32.mrf.mxu1  ;;  %v1005_v32 = vadd.f32 %v1004_v30, %v1872_v15  ;;  %v995_v15 = vadd.f32 %v1890_v23, %v1876_v35 }
 0x25f   :  { %v1035_v42 = vadd.f32 %v1034_v63, %v1860_v13  ;;  %v1074_v0 = vmax.f32 %v1033_v54, 0.0  ;;  %v1066_v9 = vmax.f32 %v1013_v5, 0.0  ;;  %v1067_v63 = vmax.f32 %v1015_v28, 0.0 }
 0x260   :  { %v1036_v11 = vpop.f32.mrf.mxu1  ;;  %v1063_v30 = vmax.f32 %v1005_v32, 0.0  ;;  %v1059_v38 = vmax.f32 %v995_v15, 0.0 }
 0x261   :  { %v1037_v6 = vadd.f32 %v1036_v11, %v1860_v13  ;;  %v1075_v37 = vmax.f32 %v1035_v42, 0.0  ;;  %v1072_v13 = vmax.f32 %v1027_v22, 0.0  ;;  %v1092_v11 = vpack.c.bf16 %v1071_v57, %v1069_v53 }
 0x262   :  { %v1040_v8 = vpop.f32.mrf.mxu1 }
 0x263   :  { %v1041_v36 = vadd.f32 %v1040_v8, %v1854_v26  ;;  %v1076_v40 = vmax.f32 %v1037_v6, 0.0  ;;  %v1094_v14 = vpack.c.bf16 %v1075_v37, %v1073_v27  ;;  %v1093_v61 = vpack.c.bf16 %v1072_v13, %v1070_v52 }
 0x264   :  { %v1042_v1 = vpop.f32.mrf.mxu1  ;;  %v1089_v6 = vpack.c.bf16 %v1064_v41, %v1062_v39 }
 0x265   :  { %v1043_v49 = vadd.f32 %v1042_v1, %v1854_v26  ;;  %v1077_v16 = vmax.f32 %v1041_v36, 0.0  ;;  %v1095_v2 = vpack.c.bf16 %v1076_v40, %v1074_v0 }
 0x266   :  { %v1044_v24 = vpop.f32.mrf.mxu1 }
 0x267   :  { %v1045_v48 = vadd.f32 %v1044_v24, %v1856_v43  ;;  %v1078_v29 = vmax.f32 %v1043_v49, 0.0  ;;  %v1061_v49 = vmax.f32 %v1001_v4, 0.0 }
 0x268   :  { %v1046_v51 = vpop.f32.mrf.mxu1 }
 0x269   :  { %v1047_v21 = vadd.f32 %v1046_v51, %v1856_v43  ;;  %v1079_v20 = vmax.f32 %v1045_v48, 0.0  ;;  %v1017_v43 = vadd.f32 %v1016_v56, %v1868_v47  ;;  %v1011_v56 = vadd.f32 %v1010_v19, %v1866_v10 }
 0x26a   :  { %v997_v47 = vadd.f32 %v1892_v58, %v1876_v35  ;;  %v993_v10 = vadd.f32 %v1886_v46, %v1874_v60  ;;  %v991_v58 = vadd.f32 %v1882_v44, %v1874_v60  ;;  %v1088_v48 = vpack.c.bf16 %v1063_v30, %v1061_v49  ;;  %v1081_v60 = vld [vmem:[%s1940_s5] sm:$0xf]  ;;  %v1102_v35 = vpop.permute.xlu0 %1101 }
 0x26b   :  { %v1080_v25 = vmax.f32 %v1047_v21, 0.0  ;;  %v1096_v17 = vpack.c.bf16 %v1079_v20, %v1077_v16  ;;  %v1068_v33 = vmax.f32 %v1017_v43, 0.0  ;;  %v1065_v1 = vmax.f32 %v1011_v56, 0.0 }
 0x26c   :  { %v1060_v24 = vmax.f32 %v997_v47, 0.0  ;;  %v1058_v62 = vmax.f32 %v993_v10, 0.0  ;;  %v1057_v46 = vmax.f32 %v991_v58, 0.0 }
 0x26d   :  { %v1097_v26 = vpack.c.bf16 %v1080_v25, %v1078_v29  ;;  %v1091_v8 = vpack.c.bf16 %v1068_v33, %v1066_v9  ;;  %v1090_v19 = vpack.c.bf16 %v1067_v63, %v1065_v1 }
 0x26e   :  { %v1087_v36 = vpack.c.bf16 %v1060_v24, %v1058_v62  ;;  %v1086_v51 = vpack.c.bf16 %v1059_v38, %v1057_v46 }
 0x26f   :  { %1104 = vmatprep.subr.bf16.mxu1 %v1097_v26 }
 0x270   :  { %1105 = vmatpush1.bf16.msra.mxu1 %v1096_v17 }
 0x271   :  { %1106 = vmatprep.subr.bf16.mxu1 %v1095_v2 }
 0x274   :  { %1107 = vmatpush1.bf16.msra.mxu1 %v1094_v14 }
 0x275   :  { %1108 = vmatprep.subr.bf16.mxu1 %v1093_v61 }
 0x278   :  { %1109 = vmatpush1.bf16.msra.mxu1 %v1092_v11 }
 0x279   :  { %1110 = vmatprep.subr.bf16.mxu1 %v1091_v8 }
 0x27c   :  { %1111 = vmatpush1.bf16.msra.mxu1 %v1090_v19 }
 0x27d   :  { %1112 = vmatprep.subr.bf16.mxu1 %v1089_v6 }
 0x280   :  { %1113 = vmatpush1.bf16.msra.mxu1 %v1088_v48 }
 0x281   :  { %1114 = vmatprep.subr.bf16.mxu1 %v1087_v36 }
 0x284   :  { %1115 = vmatpush1.bf16.msra.mxu1 %v1086_v51 }
 0x285   :  { %1116 = vmatprep.subr.bf16.mxu1 %v1888_v12 }
 0x288   :  { %1117 = vmatpush1.bf16.msra.mxu1 %v1884_v34 }
 0x289   :  { %1118 = vmatprep.subr.bf16.mxu1 %v1880_v50 }
 0x28c   :  { %1119 = vmatpush1.bf16.msra.mxu1 %v1878_v3 }
 0x28f   :  { %1137 = vmatmul.mubr.bf16.vlgmr.msra.gmra.mxu1 %v1081_v60 }
 0x34f   :  { %v1138_v44 = vpop.f32.mrf.mxu1 }
 0x350   :  { %v1139_v23 = vadd.f32 %v1138_v44, %v1102_v35 }
 0x351   :  { %v1140_v54 = vpop.f32.mrf.mxu1 }
 0x352   :  { %1270 = vtanh.f32 %v1139_v23 }
 0x353   :  { %v1142_v21 = vpop.f32.mrf.mxu1 }
 0x355   :  { %v1143_v42 = vpop.f32.mrf.mxu1 }
 0x35f   :  { %v1271_v20 = vpop.eup %1270 }
 0x360   :  { %1180 = vst [vmem:[%s1942_s7] sm:$0xff] %v1271_v20 }

</bundles_post_ra>
